<compile_context>
chip_gen: v6e
topology: v6e:2x2x1
jax: 0.10.0
libtpu: 0.0.40
codegen_flags: <defaults>
</compile_context>

<pallas_src>
import jax
import jax.numpy as jnp
from jax.experimental import pallas as pl
from jax.experimental.pallas import tpu as pltpu

LAYER_SIZES = [784, 200, 100, 70, 30, 10]
IN_FEATURES = LAYER_SIZES[0]
NUM_CLASSES = LAYER_SIZES[-1]
OUT_PAD = 128               # lane-dense output width for the final layer
NEG_PAD = -1e30             # bias for padded logit columns (exp underflows to 0 in f32)
DEFAULT_BLOCK_BATCH = 2048  # large tile -> per-step overhead amortized
MIN_SPLIT_TILE = 256        # only split a single-tile batch in two if each half >= this


def _round_up(n, m):
    return ((n + m - 1) // m) * m


def _cdiv(a, b):
    return -(-a // b)


def _mlp_kernel(x_ref,
                w1_ref, b1_ref,
                w2_ref, b2_ref,
                w3_ref, b3_ref,
                w4_ref, b4_ref,
                w5_ref, b5_ref,
                out_ref):
    # x_ref: (TB, 784) tile in its *native* dtype (usually f32); the bf16 cast
    # happens here on the VPU instead of as a separate XLA fusion in the wrapper.
    h = x_ref[...]

    def dense(h, w_ref, b_ref, relu):
        # bf16 x bf16 -> f32 on the MXU; bias add / ReLU ride free VPU slots in f32.
        y = jnp.dot(h.astype(jnp.bfloat16), w_ref[...],
                    preferred_element_type=jnp.float32) + b_ref[...]
        return jnp.maximum(y, 0.0) if relu else y

    h = dense(h, w1_ref, b1_ref, relu=True)
    h = dense(h, w2_ref, b2_ref, relu=True)
    h = dense(h, w3_ref, b3_ref, relu=True)
    h = dense(h, w4_ref, b4_ref, relu=True)

    # Final linear: (TB, 128) f32; padded columns carry ~-1e30 from the padded bias.
    logits = dense(h, w5_ref, b5_ref, relu=False)

    # log_softmax in f32 over the feature axis; padded lanes contribute exp(-huge)==0.
    # Only the final result is cast to the (bf16) output dtype.
    m = jnp.max(logits, axis=-1, keepdims=True)
    shifted = logits - m
    lse = jnp.log(jnp.sum(jnp.exp(shifted), axis=-1, keepdims=True))
    out_ref[...] = (shifted - lse).astype(out_ref.dtype)


def prepare_params(params):
    """Cast weights to bf16, keep biases f32, pad the last layer to OUT_PAD lanes.

    params: list of (W_t (in, out) f32, b (1, out) f32).
    Returns the flat list of kernel operands [w1, b1, ..., w5, b5].
    """
    kparams = []
    last = len(params) - 1
    for i, (w, b) in enumerate(params):
        w = w.astype(jnp.bfloat16)
        b = b.astype(jnp.float32)
        if i == last:
            pad = OUT_PAD - w.shape[1]
            w = jnp.pad(w, ((0, 0), (0, pad)))
            b = jnp.pad(b, ((0, 0), (0, pad)), constant_values=NEG_PAD)
        kparams.append(w)
        kparams.append(b)
    return kparams


def _pick_tiling(B, block_batch):
    """Choose (tb, b_pad): both multiples of 8, b_pad % tb == 0, minimal padding.

    Padding waste is at most 7 rows per tile (vs. up to tb-1 before).  When the
    whole batch fits in one tile but is reasonably large, split it in two so the
    "parallel" grid axis can shard across v7x's two TensorCores.
    """
    b8 = _round_up(max(B, 1), 8)
    if b8 <= block_batch:
        if b8 >= 2 * MIN_SPLIT_TILE:
            tb = _round_up(_cdiv(b8, 2), 8)
            return tb, 2 * tb
        return b8, b8
    n = _cdiv(b8, block_batch)
    tb = _round_up(_cdiv(b8, n), 8)
    return tb, n * tb


def _vmem_limit_bytes(tb, x_itemsize, kparams):
    """Scoped-VMEM budget: double-buffered streaming tiles + resident params + headroom.

    Raises v5e's 16 MiB default when needed; capped at 56 MiB to stay safely under
    v7x's 64 MiB physical VMEM per TensorCore.
    """
    x_tile = tb * IN_FEATURES * x_itemsize
    out_tile = tb * OUT_PAD * 2  # bf16 output
    param_bytes = sum(int(a.size) * a.dtype.itemsize for a in kparams)
    limit = 2 * (x_tile + out_tile) + param_bytes + (16 << 20)
    return int(min(max(limit, 32 << 20), 56 << 20))


def dense_forward_padded(x, kparams, block_batch=DEFAULT_BLOCK_BATCH):
    """Run the MLP. Returns a (b_pad, OUT_PAD) bf16 buffer of log-probs.

    Rows >= x.shape[0] and columns >= NUM_CLASSES are padding; slice them away in
    the consumer (or fuse the slice there) rather than in a separate pass here.
    x is passed in its native dtype; the bf16 cast happens inside the kernel.
    """
    assert x.ndim == 2 and x.shape[1] == IN_FEATURES, x.shape
    assert kparams[-2].shape[1] == OUT_PAD, (
        "kparams must come from prepare_params() (final layer padded to OUT_PAD)")

    B = x.shape[0]
    tb, b_pad = _pick_tiling(B, block_batch)
    if b_pad != B:
        # Only when B is not already tile-aligned; with the tight tiling above the
        # waste is <= 7 rows per tile.  Padded rows are finite zeros and are
        # dropped by the consumer.
        x = jnp.pad(x, ((0, b_pad - B), (0, 0)))

    in_specs = [pl.BlockSpec((tb, IN_FEATURES), lambda i: (i, 0))]
    for arr in kparams:
        # Whole-array, grid-invariant blocks -> weights/biases stay VMEM-resident.
        in_specs.append(pl.BlockSpec(arr.shape, lambda i: (0, 0)))

    # NOTE: if a v7x profile ever shows exposed DMA at step boundaries, add
    # pipeline_mode=pl.Buffered(3) to the x BlockSpec above (one extra x tile of VMEM).
    return pl.pallas_call(
        _mlp_kernel,
        out_shape=jax.ShapeDtypeStruct((b_pad, OUT_PAD), jnp.bfloat16),
        grid=(b_pad // tb,),
        in_specs=in_specs,
        out_specs=pl.BlockSpec((tb, OUT_PAD), lambda i: (i, 0)),
        compiler_params=pltpu.CompilerParams(
            dimension_semantics=("parallel",),
            vmem_limit_bytes=_vmem_limit_bytes(tb, x.dtype.itemsize, kparams)),
    )(x, *kparams)


def dense_forward(x, kparams, block_batch=DEFAULT_BLOCK_BATCH):
    """Convenience wrapper returning (B, 10) log-probs.

    In a real pipeline, keep the padded buffer from dense_forward_padded and fuse
    this slice into the consumer (e.g. the NLL-loss gather) to avoid an extra pass.
    """
    out = dense_forward_padded(x, kparams, block_batch)
    return out[:x.shape[0], :NUM_CLASSES]


def init_params(key):
    """Xavier-uniform weights (as in the PyTorch module), PyTorch-default-style biases.
    Weights are stored pre-transposed in (in, out) layout."""
    params = []
    for i in range(len(LAYER_SIZES) - 1):
        fan_in, fan_out = LAYER_SIZES[i], LAYER_SIZES[i + 1]
        key, wk, bk = jax.random.split(key, 3)
        limit = jnp.sqrt(6.0 / (fan_in + fan_out))
        w_t = jax.random.uniform(wk, (fan_in, fan_out), jnp.float32, -limit, limit)
        b_limit = 1.0 / jnp.sqrt(fan_in)
        b = jax.random.uniform(bk, (1, fan_out), jnp.float32, -b_limit, b_limit)
        params.append((w_t, b))
    return params


def reference_forward(x, params):
    """Pure-JAX reference mirroring the kernel's dtype policy (bf16 matmuls, f32 acc)."""
    h = x
    n = len(params)
    logits = None
    for i, (w, b) in enumerate(params):
        y = jnp.dot(h.astype(jnp.bfloat16), w.astype(jnp.bfloat16),
                    preferred_element_type=jnp.float32) + b
        if i < n - 1:
            h = jnp.maximum(y, 0.0)
        else:
            logits = y
    return jax.nn.log_softmax(logits, axis=-1)


if __name__ == "__main__":
    key = jax.random.PRNGKey(0)
    pkey, k1, k2, k3 = jax.random.split(key, 4)
    params = init_params(pkey)
    kparams = prepare_params(params)

    def check(x, block_batch=DEFAULT_BLOCK_BATCH, tag=""):
        out = jax.block_until_ready(dense_forward(x, kparams, block_batch))
        ref = reference_forward(x, params)
        assert out.shape == (x.shape[0], NUM_CLASSES), (tag, out.shape)
        # Output is bf16 (per perf review); compare in f32 with bf16-level tolerance.
        assert jnp.allclose(out.astype(jnp.float32), ref, atol=5e-2, rtol=2e-2), (
            f"mismatch vs reference ({tag})")

    # Small single-tile case (8 rows: already sublane-aligned, no padding copy).
    check(jax.random.normal(k1, (8, IN_FEATURES), jnp.float32), tag="small")

    # Batch needing sublane padding (130 -> 136-row single tile, 6 padded rows).
    check(jax.random.normal(k2, (130, IN_FEATURES), jnp.float32), tag="padded")

    # Multi-tile case: 600 rows split exactly into 3 tiles of 200 (grid=(3,), no padding).
    check(jax.random.normal(k3, (600, IN_FEATURES), jnp.float32),
          block_batch=256, tag="tiled")

    print("KERNEL_OK")
</pallas_src>

<mosaic_0001>
module attributes {stable_mosaic.version = 11 : i64} {
  func.func @_mlp_kernel(%arg0: i32, %arg1: memref<8x784xf32, #tpu.memory_space<vmem>>, %arg2: memref<784x200xbf16, #tpu.memory_space<vmem>>, %arg3: memref<1x200xf32, #tpu.memory_space<vmem>>, %arg4: memref<200x100xbf16, #tpu.memory_space<vmem>>, %arg5: memref<1x100xf32, #tpu.memory_space<vmem>>, %arg6: memref<100x70xbf16, #tpu.memory_space<vmem>>, %arg7: memref<1x70xf32, #tpu.memory_space<vmem>>, %arg8: memref<70x30xbf16, #tpu.memory_space<vmem>>, %arg9: memref<1x30xf32, #tpu.memory_space<vmem>>, %arg10: memref<30x128xbf16, #tpu.memory_space<vmem>>, %arg11: memref<1x128xf32, #tpu.memory_space<vmem>>, %arg12: memref<8x128xbf16, #tpu.memory_space<vmem>>) attributes {dimension_semantics = [#tpu.dimension_semantics<parallel>], iteration_bounds = array<i64: 1>, scalar_prefetch = 0 : i64, scratch_operands = 0 : i64, tpu.core_type = #tpu.core_type<tc>, window_params = [{transform_indices = @transform_0, window_bounds = array<i64: 8, 784>}, {pipeline_mode = #tpu.pipeline_mode<synchronous>, transform_indices = @transform_1, window_bounds = array<i64: 784, 200>}, {pipeline_mode = #tpu.pipeline_mode<synchronous>, transform_indices = @transform_2, window_bounds = array<i64: 1, 200>}, {pipeline_mode = #tpu.pipeline_mode<synchronous>, transform_indices = @transform_3, window_bounds = array<i64: 200, 100>}, {pipeline_mode = #tpu.pipeline_mode<synchronous>, transform_indices = @transform_4, window_bounds = array<i64: 1, 100>}, {pipeline_mode = #tpu.pipeline_mode<synchronous>, transform_indices = @transform_5, window_bounds = array<i64: 100, 70>}, {pipeline_mode = #tpu.pipeline_mode<synchronous>, transform_indices = @transform_6, window_bounds = array<i64: 1, 70>}, {pipeline_mode = #tpu.pipeline_mode<synchronous>, transform_indices = @transform_7, window_bounds = array<i64: 70, 30>}, {pipeline_mode = #tpu.pipeline_mode<synchronous>, transform_indices = @transform_8, window_bounds = array<i64: 1, 30>}, {pipeline_mode = #tpu.pipeline_mode<synchronous>, transform_indices = @transform_9, window_bounds = array<i64: 30, 128>}, {pipeline_mode = #tpu.pipeline_mode<synchronous>, transform_indices = @transform_10, window_bounds = array<i64: 1, 128>}, {transform_indices = @transform_11, window_bounds = array<i64: 8, 128>}]} {
    %c0 = arith.constant 0 : index
    %c0_0 = arith.constant 0 : index
    %0 = vector.load %arg1[%c0, %c0_0] : memref<8x784xf32, #tpu.memory_space<vmem>>, vector<8x784xf32>
    %1 = arith.truncf %0 : vector<8x784xf32> to vector<8x784xbf16>
    %c0_1 = arith.constant 0 : index
    %c0_2 = arith.constant 0 : index
    %2 = vector.load %arg2[%c0_1, %c0_2] : memref<784x200xbf16, #tpu.memory_space<vmem>>, vector<784x200xbf16>
    %cst = arith.constant dense<0.000000e+00> : vector<8x200xf32>
    %3 = tpu.matmul %1, %2, %cst {dimension_numbers = #tpu.dot_dimension_numbers<[1], [0], [0], [1], [0, 0, 1, 1], [], []>} : vector<8x784xbf16>, vector<784x200xbf16>, vector<8x200xf32> -> vector<8x200xf32>
    %c0_3 = arith.constant 0 : index
    %c0_4 = arith.constant 0 : index
    %4 = vector.load %arg3[%c0_3, %c0_4] : memref<1x200xf32, #tpu.memory_space<vmem>>, vector<1x200xf32>
    %5 = vector.broadcast %4 : vector<1x200xf32> to vector<8x200xf32>
    %6 = arith.addf %3, %5 : vector<8x200xf32>
    %cst_5 = arith.constant 0.000000e+00 : f32
    %7 = vector.broadcast %cst_5 : f32 to vector<8x200xf32>
    %8 = arith.maximumf %6, %7 : vector<8x200xf32>
    %9 = arith.truncf %8 : vector<8x200xf32> to vector<8x200xbf16>
    %c0_6 = arith.constant 0 : index
    %c0_7 = arith.constant 0 : index
    %10 = vector.load %arg4[%c0_6, %c0_7] : memref<200x100xbf16, #tpu.memory_space<vmem>>, vector<200x100xbf16>
    %cst_8 = arith.constant dense<0.000000e+00> : vector<8x100xf32>
    %11 = tpu.matmul %9, %10, %cst_8 {dimension_numbers = #tpu.dot_dimension_numbers<[1], [0], [0], [1], [0, 0, 1, 1], [], []>} : vector<8x200xbf16>, vector<200x100xbf16>, vector<8x100xf32> -> vector<8x100xf32>
    %c0_9 = arith.constant 0 : index
    %c0_10 = arith.constant 0 : index
    %12 = vector.load %arg5[%c0_9, %c0_10] : memref<1x100xf32, #tpu.memory_space<vmem>>, vector<1x100xf32>
    %13 = vector.broadcast %12 : vector<1x100xf32> to vector<8x100xf32>
    %14 = arith.addf %11, %13 : vector<8x100xf32>
    %cst_11 = arith.constant 0.000000e+00 : f32
    %15 = vector.broadcast %cst_11 : f32 to vector<8x100xf32>
    %16 = arith.maximumf %14, %15 : vector<8x100xf32>
    %17 = arith.truncf %16 : vector<8x100xf32> to vector<8x100xbf16>
    %c0_12 = arith.constant 0 : index
    %c0_13 = arith.constant 0 : index
    %18 = vector.load %arg6[%c0_12, %c0_13] : memref<100x70xbf16, #tpu.memory_space<vmem>>, vector<100x70xbf16>
    %cst_14 = arith.constant dense<0.000000e+00> : vector<8x70xf32>
    %19 = tpu.matmul %17, %18, %cst_14 {dimension_numbers = #tpu.dot_dimension_numbers<[1], [0], [0], [1], [0, 0, 1, 1], [], []>} : vector<8x100xbf16>, vector<100x70xbf16>, vector<8x70xf32> -> vector<8x70xf32>
    %c0_15 = arith.constant 0 : index
    %c0_16 = arith.constant 0 : index
    %20 = vector.load %arg7[%c0_15, %c0_16] : memref<1x70xf32, #tpu.memory_space<vmem>>, vector<1x70xf32>
    %21 = vector.broadcast %20 : vector<1x70xf32> to vector<8x70xf32>
    %22 = arith.addf %19, %21 : vector<8x70xf32>
    %cst_17 = arith.constant 0.000000e+00 : f32
    %23 = vector.broadcast %cst_17 : f32 to vector<8x70xf32>
    %24 = arith.maximumf %22, %23 : vector<8x70xf32>
    %25 = arith.truncf %24 : vector<8x70xf32> to vector<8x70xbf16>
    %c0_18 = arith.constant 0 : index
    %c0_19 = arith.constant 0 : index
    %26 = vector.load %arg8[%c0_18, %c0_19] : memref<70x30xbf16, #tpu.memory_space<vmem>>, vector<70x30xbf16>
    %cst_20 = arith.constant dense<0.000000e+00> : vector<8x30xf32>
    %27 = tpu.matmul %25, %26, %cst_20 {dimension_numbers = #tpu.dot_dimension_numbers<[1], [0], [0], [1], [0, 0, 1, 1], [], []>} : vector<8x70xbf16>, vector<70x30xbf16>, vector<8x30xf32> -> vector<8x30xf32>
    %c0_21 = arith.constant 0 : index
    %c0_22 = arith.constant 0 : index
    %28 = vector.load %arg9[%c0_21, %c0_22] : memref<1x30xf32, #tpu.memory_space<vmem>>, vector<1x30xf32>
    %29 = vector.broadcast %28 : vector<1x30xf32> to vector<8x30xf32>
    %30 = arith.addf %27, %29 : vector<8x30xf32>
    %cst_23 = arith.constant 0.000000e+00 : f32
    %31 = vector.broadcast %cst_23 : f32 to vector<8x30xf32>
    %32 = arith.maximumf %30, %31 : vector<8x30xf32>
    %33 = arith.truncf %32 : vector<8x30xf32> to vector<8x30xbf16>
    %c0_24 = arith.constant 0 : index
    %c0_25 = arith.constant 0 : index
    %34 = vector.load %arg10[%c0_24, %c0_25] : memref<30x128xbf16, #tpu.memory_space<vmem>>, vector<30x128xbf16>
    %cst_26 = arith.constant dense<0.000000e+00> : vector<8x128xf32>
    %35 = tpu.matmul %33, %34, %cst_26 {dimension_numbers = #tpu.dot_dimension_numbers<[1], [0], [0], [1], [0, 0, 1, 1], [], []>} : vector<8x30xbf16>, vector<30x128xbf16>, vector<8x128xf32> -> vector<8x128xf32>
    %c0_27 = arith.constant 0 : index
    %c0_28 = arith.constant 0 : index
    %36 = vector.load %arg11[%c0_27, %c0_28] : memref<1x128xf32, #tpu.memory_space<vmem>>, vector<1x128xf32>
    %37 = vector.broadcast %36 : vector<1x128xf32> to vector<8x128xf32>
    %38 = arith.addf %35, %37 : vector<8x128xf32>
    %cst_29 = arith.constant dense<0xFF800000> : vector<8xf32>
    %39 = vector.multi_reduction <maximumf>, %38, %cst_29 [1] : vector<8x128xf32> to vector<8xf32>
    %40 = vector.shape_cast %39 : vector<8xf32> to vector<8x1xf32>
    %41 = vector.broadcast %40 : vector<8x1xf32> to vector<8x128xf32>
    %42 = arith.subf %38, %41 : vector<8x128xf32>
    %43 = math.exp %42 : vector<8x128xf32>
    %cst_30 = arith.constant dense<0.000000e+00> : vector<8xf32>
    %44 = vector.multi_reduction <add>, %43, %cst_30 [1] : vector<8x128xf32> to vector<8xf32>
    %45 = vector.shape_cast %44 : vector<8xf32> to vector<8x1xf32>
    %46 = math.log %45 : vector<8x1xf32>
    %47 = vector.broadcast %46 : vector<8x1xf32> to vector<8x128xf32>
    %48 = arith.subf %42, %47 : vector<8x128xf32>
    %49 = arith.truncf %48 : vector<8x128xf32> to vector<8x128xbf16>
    %c0_31 = arith.constant 0 : index
    %c0_32 = arith.constant 0 : index
    %50 = vector.load %arg12[%c0_31, %c0_32] : memref<8x128xbf16, #tpu.memory_space<vmem>>, vector<8x128xbf16>
    tpu.vector_store %arg12[%c0_31, %c0_32], %49 {strides = array<i32>} : memref<8x128xbf16, #tpu.memory_space<vmem>>, vector<8x128xbf16>,
    return
  }
  func.func @transform_0(%arg0: i32) -> (i32, i32) {
    %c0_i32 = arith.constant 0 : i32
    %c0_i32_0 = arith.constant 0 : i32
    return %arg0, %c0_i32 : i32, i32
  }
  func.func @transform_1(%arg0: i32) -> (i32, i32) {
    %c0_i32 = arith.constant 0 : i32
    %c0_i32_0 = arith.constant 0 : i32
    %c0_i32_1 = arith.constant 0 : i32
    return %c0_i32, %c0_i32_0 : i32, i32
  }
  func.func @transform_2(%arg0: i32) -> (i32, i32) {
    %c0_i32 = arith.constant 0 : i32
    %c0_i32_0 = arith.constant 0 : i32
    %c0_i32_1 = arith.constant 0 : i32
    return %c0_i32, %c0_i32_0 : i32, i32
  }
  func.func @transform_3(%arg0: i32) -> (i32, i32) {
    %c0_i32 = arith.constant 0 : i32
    %c0_i32_0 = arith.constant 0 : i32
    %c0_i32_1 = arith.constant 0 : i32
    return %c0_i32, %c0_i32_0 : i32, i32
  }
  func.func @transform_4(%arg0: i32) -> (i32, i32) {
    %c0_i32 = arith.constant 0 : i32
    %c0_i32_0 = arith.constant 0 : i32
    %c0_i32_1 = arith.constant 0 : i32
    return %c0_i32, %c0_i32_0 : i32, i32
  }
  func.func @transform_5(%arg0: i32) -> (i32, i32) {
    %c0_i32 = arith.constant 0 : i32
    %c0_i32_0 = arith.constant 0 : i32
    %c0_i32_1 = arith.constant 0 : i32
    return %c0_i32, %c0_i32_0 : i32, i32
  }
  func.func @transform_6(%arg0: i32) -> (i32, i32) {
    %c0_i32 = arith.constant 0 : i32
    %c0_i32_0 = arith.constant 0 : i32
    %c0_i32_1 = arith.constant 0 : i32
    return %c0_i32, %c0_i32_0 : i32, i32
  }
  func.func @transform_7(%arg0: i32) -> (i32, i32) {
    %c0_i32 = arith.constant 0 : i32
    %c0_i32_0 = arith.constant 0 : i32
    %c0_i32_1 = arith.constant 0 : i32
    return %c0_i32, %c0_i32_0 : i32, i32
  }
  func.func @transform_8(%arg0: i32) -> (i32, i32) {
    %c0_i32 = arith.constant 0 : i32
    %c0_i32_0 = arith.constant 0 : i32
    %c0_i32_1 = arith.constant 0 : i32
    return %c0_i32, %c0_i32_0 : i32, i32
  }
  func.func @transform_9(%arg0: i32) -> (i32, i32) {
    %c0_i32 = arith.constant 0 : i32
    %c0_i32_0 = arith.constant 0 : i32
    %c0_i32_1 = arith.constant 0 : i32
    return %c0_i32, %c0_i32_0 : i32, i32
  }
  func.func @transform_10(%arg0: i32) -> (i32, i32) {
    %c0_i32 = arith.constant 0 : i32
    %c0_i32_0 = arith.constant 0 : i32
    %c0_i32_1 = arith.constant 0 : i32
    return %c0_i32, %c0_i32_0 : i32, i32
  }
  func.func @transform_11(%arg0: i32) -> (i32, i32) {
    %c0_i32 = arith.constant 0 : i32
    %c0_i32_0 = arith.constant 0 : i32
    return %arg0, %c0_i32 : i32, i32
  }
}

</mosaic_0001>

<bundles_post_ra>
// kernel: tpu_custom_call.1
= control target key start
LH: loop header
LB: loop body
LE: loop exit
PB: predicated region body
PF: predicated region fallthrough
CT: control target
= control target key end

     0   :  { %vm654_vm0 = vcmask 130048   ;;  %s2189_s0 = inlined_call_operand.vmem [shape: f32[8,784], index: 0, kind: input, shape index: {}]   ;;  %s2190_s1 = inlined_call_operand.vmem [shape: bf16[784,200], index: 1, kind: input, shape index: {}]   ;;  %s2191_s2 = inlined_call_operand.vmem [shape: f32[1,200], index: 2, kind: input, shape index: {}]   ;;  %s2192_s3 = inlined_call_operand.vmem [shape: bf16[200,100], index: 3, kind: input, shape index: {}]   ;;  %s2193_s4 = inlined_call_operand.vmem [shape: f32[1,100], index: 4, kind: input, shape index: {}]   ;;  %s2194_s5 = inlined_call_operand.vmem [shape: bf16[100,70], index: 5, kind: input, shape index: {}]   ;;  %s2195_s6 = inlined_call_operand.vmem [shape: f32[1,70], index: 6, kind: input, shape index: {}]   ;;  %s2196_s7 = inlined_call_operand.vmem [shape: bf16[70,30], index: 7, kind: input, shape index: {}]   ;;  %s2197_s8 = inlined_call_operand.vmem [shape: f32[1,30], index: 8, kind: input, shape index: {}]   ;;  %s2198_s9 = inlined_call_operand.vmem [shape: bf16[30,128], index: 9, kind: input, shape index: {}]   ;;  %s2199_s10 = inlined_call_operand.vmem [shape: f32[1,128], index: 10, kind: input, shape index: {}]   ;;  %s2200_s11 = inlined_call_operand.hbm [shape: bf16[8,128], index: 11, kind: output, shape index: {}]  }
   0x1   :  { %v1476_v0 = vld [vmem:[%s2190_s1 + $0x74] ss:$8 sps:$4 sm:$0xff]   ;;  %v1478_v1 = vld [vmem:[%s2190_s1 + $0x70] ss:$8 sps:$4 sm:$0xff]   ;;  %v1482_v4 = vld [vmem:[%s2190_s1 + $0x64] ss:$8 sps:$4 sm:$0xff]  }
   0x2   :  { %658 = vmatprep.subr.bf16.mxu0 %v1476_v0  ;;  %v1479_v2 = vld [vmem:[%s2190_s1 + $0x174] ss:$8 sps:$4 sm:$0xff]   ;;  %v1481_v3 = vld [vmem:[%s2190_s1 + $0x170] ss:$8 sps:$4 sm:$0xff]   ;;  %v1484_v5 = vld [vmem:[%s2190_s1 + $0x60] ss:$8 sps:$4 sm:$0xff]  }
   0x3   :  { %659 = vmatpush1.bf16.msra.mxu0 %v1478_v1  ;;  %699 = vmatprep.subr.bf16.mxu1 %v1479_v2  ;;  %v1485_v6 = vld [vmem:[%s2190_s1 + $0x164] ss:$8 sps:$4 sm:$0xff]   ;;  %v1487_v7 = vld [vmem:[%s2190_s1 + $0x160] ss:$8 sps:$4 sm:$0xff]   ;;  %v1488_v8 = vld [vmem:[%s2190_s1 + $0x54] ss:$8 sps:$4 sm:$0xff]  }
   0x4   :  { %700 = vmatpush1.bf16.msra.mxu1 %v1481_v3  ;;  %660 = vmatprep.subr.bf16.mxu0 %v1482_v4  ;;  %v1490_v9 = vld [vmem:[%s2190_s1 + $0x50] ss:$8 sps:$4 sm:$0xff]   ;;  %v1491_v10 = vld [vmem:[%s2190_s1 + $0x154] ss:$8 sps:$4 sm:$0xff]   ;;  %v1494_v11 = vld [vmem:[%s2190_s1 + $0x44] ss:$8 sps:$4 sm:$0xff]  }
   0x5   :  { %701 = vmatprep.subr.bf16.mxu1 %v1485_v6  ;;  %v1493_v12 = vld [vmem:[%s2190_s1 + $0x150] ss:$8 sps:$4 sm:$0xff]   ;;  %v1497_v13 = vld [vmem:[%s2190_s1 + $0x144] ss:$8 sps:$4 sm:$0xff]   ;;  %v1496_v14 = vld [vmem:[%s2190_s1 + $0x40] ss:$8 sps:$4 sm:$0xff]  }
   0x6   :  { %v1500_v15 = vld [vmem:[%s2190_s1 + $0x34] ss:$8 sps:$4 sm:$0xff]   ;;  %v1499_v16 = vld [vmem:[%s2190_s1 + $0x140] ss:$8 sps:$4 sm:$0xff]   ;;  %v1502_v18 = vld [vmem:[%s2190_s1 + $0x30] ss:$8 sps:$4 sm:$0xff]  }
   0x7   :  { %661 = vmatpush1.bf16.msra.mxu0 %v1484_v5  ;;  %v1503_v17 = vld [vmem:[%s2190_s1 + $0x134] ss:$8 sps:$4 sm:$0xff]   ;;  %v1506_v19 = vld [vmem:[%s2190_s1 + $0x24] ss:$8 sps:$4 sm:$0xff]   ;;  %v1505_v20 = vld [vmem:[%s2190_s1 + $0x130] ss:$8 sps:$4 sm:$0xff]  }
   0x8   :  { %662 = vmatprep.subr.bf16.mxu0 %v1488_v8  ;;  %702 = vmatpush1.bf16.msra.mxu1 %v1487_v7  ;;  %v1509_v21 = vld [vmem:[%s2190_s1 + $0x124] ss:$8 sps:$4 sm:$0xff]   ;;  %v1508_v22 = vld [vmem:[%s2190_s1 + $0x20] ss:$8 sps:$4 sm:$0xff]   ;;  %v1512_v23 = vld [vmem:[%s2190_s1 + $0x14] ss:$8 sps:$4 sm:$0xff]  }
   0x9   :  { %703 = vmatprep.subr.bf16.mxu1 %v1491_v10  ;;  %v1511_v24 = vld [vmem:[%s2190_s1 + $0x120] ss:$8 sps:$4 sm:$0xff]   ;;  %v1515_v25 = vld [vmem:[%s2190_s1 + $0x114] ss:$8 sps:$4 sm:$0xff]   ;;  %v1514_v26 = vld [vmem:[%s2190_s1 + $0x10] ss:$8 sps:$4 sm:$0xff]  }
   0xa   :  { %v1518_v27 = vld [vmem:[%s2190_s1 + $0x4] ss:$8 sps:$4 sm:$0xff]   ;;  %v1517_v28 = vld [vmem:[%s2190_s1 + $0x110] ss:$8 sps:$4 sm:$0xff]   ;;  %v1520_v30 = vld [vmem:[%s2190_s1] ss:$8 sps:$4 sm:$0xff]  }
   0xb   :  { %663 = vmatpush1.bf16.msra.mxu0 %v1490_v9  ;;  %v1521_v29 = vld [vmem:[%s2190_s1 + $0x104] ss:$8 sps:$4 sm:$0xff]   ;;  %v1524_v31 = vld [vmem:[%s2190_s1 + $0xf4] ss:$8 sps:$4 sm:$0xff]   ;;  %v1523_v32 = vld [vmem:[%s2190_s1 + $0x100] ss:$8 sps:$4 sm:$0xff]  }
   0xc   :  { %664 = vmatprep.subr.bf16.mxu0 %v1494_v11  ;;  %704 = vmatpush1.bf16.msra.mxu1 %v1493_v12  ;;  %v1527_v33 = vld [vmem:[%s2190_s1 + $0x1f4] ss:$8 sps:$4 sm:$0xff]   ;;  %v1526_v34 = vld [vmem:[%s2190_s1 + $0xf0] ss:$8 sps:$4 sm:$0xff]   ;;  %v1530_v35 = vld [vmem:[%s2190_s1 + $0xe4] ss:$8 sps:$4 sm:$0xff]  }
   0xd   :  { %705 = vmatprep.subr.bf16.mxu1 %v1497_v13  ;;  %v1529_v36 = vld [vmem:[%s2190_s1 + $0x1f0] ss:$8 sps:$4 sm:$0xff]   ;;  %v1533_v37 = vld [vmem:[%s2190_s1 + $0x1e4] ss:$8 sps:$4 sm:$0xff]   ;;  %v1532_v38 = vld [vmem:[%s2190_s1 + $0xe0] ss:$8 sps:$4 sm:$0xff]  }
   0xe   :  { %v1536_v39 = vld [vmem:[%s2190_s1 + $0xd4] ss:$8 sps:$4 sm:$0xff]   ;;  %v1535_v40 = vld [vmem:[%s2190_s1 + $0x1e0] ss:$8 sps:$4 sm:$0xff]   ;;  %v1538_v42 = vld [vmem:[%s2190_s1 + $0xd0] ss:$8 sps:$4 sm:$0xff]  }
   0xf   :  { %665 = vmatpush1.bf16.msra.mxu0 %v1496_v14  ;;  %v1539_v41 = vld [vmem:[%s2190_s1 + $0x1d4] ss:$8 sps:$4 sm:$0xff]   ;;  %v1542_v43 = vld [vmem:[%s2190_s1 + $0xc4] ss:$8 sps:$4 sm:$0xff]   ;;  %v1541_v44 = vld [vmem:[%s2190_s1 + $0x1d0] ss:$8 sps:$4 sm:$0xff]  }
  0x10   :  { %666 = vmatprep.subr.bf16.mxu0 %v1500_v15  ;;  %706 = vmatpush1.bf16.msra.mxu1 %v1499_v16  ;;  %v1545_v45 = vld [vmem:[%s2190_s1 + $0x1c4] ss:$8 sps:$4 sm:$0xff]   ;;  %v1544_v47 = vld [vmem:[%s2190_s1 + $0xc0] ss:$8 sps:$4 sm:$0xff]   ;;  %v1548_v49 = vld [vmem:[%s2190_s1 + $0xb4] ss:$8 sps:$4 sm:$0xff]  }
  0x11   :  { %707 = vmatprep.subr.bf16.mxu1 %v1503_v17  ;;  %v41_v46 = vld [vmem:[%s2189_s0 + $0x8] sm:$0xff]  ;;  %v43_v50 = vld [vmem:[%s2189_s0 + $0x18] sm:$0xff]  ;;  %v40_v4 = vld [vmem:[%s2189_s0] sm:$0xff] }
  0x12   :  { %v48_v48 = vpack.c.bf16 %v41_v46, %v41_v46  ;;  %v1547_v51 = vld [vmem:[%s2190_s1 + $0x1c0] ss:$8 sps:$4 sm:$0xff]   ;;  %v50_v52 = vpack.c.bf16 %v43_v50, %v43_v50  ;;  %v1551_v53 = vld [vmem:[%s2190_s1 + $0x1b4] ss:$8 sps:$4 sm:$0xff]   ;;  %v1550_v54 = vld [vmem:[%s2190_s1 + $0xb0] ss:$8 sps:$4 sm:$0xff]   ;;  %v47_v7 = vpack.c.bf16 %v40_v4, %v40_v4 }
  0x13   :  { %667 = vmatpush1.bf16.msra.mxu0 %v1502_v18  ;;  %v1554_v55 = vld [vmem:[%s2190_s1 + $0xa4] ss:$8 sps:$4 sm:$0xff]   ;;  %v1553_v56 = vld [vmem:[%s2190_s1 + $0x1b0] ss:$8 sps:$4 sm:$0xff]   ;;  %v1556_v58 = vld [vmem:[%s2190_s1 + $0xa0] ss:$8 sps:$4 sm:$0xff]  }
  0x14   :  { %668 = vmatprep.subr.bf16.mxu0 %v1506_v19  ;;  %708 = vmatpush1.bf16.msra.mxu1 %v1505_v20  ;;  %v1557_v57 = vld [vmem:[%s2190_s1 + $0x1a4] ss:$8 sps:$4 sm:$0xff]   ;;  %v1560_v59 = vld [vmem:[%s2190_s1 + $0x94] ss:$8 sps:$4 sm:$0xff]   ;;  %v1559_v60 = vld [vmem:[%s2190_s1 + $0x1a0] ss:$8 sps:$4 sm:$0xff]  }
  0x15   :  { %709 = vmatprep.subr.bf16.mxu1 %v1509_v21  ;;  %690 = vmatprep.mubr.bf16.mxu0 %v48_v48  ;;  %v1563_v61 = vld [vmem:[%s2190_s1 + $0x194] ss:$8 sps:$4 sm:$0xff]   ;;  %v1562_v62 = vld [vmem:[%s2190_s1 + $0x90] ss:$8 sps:$4 sm:$0xff]   ;;  %v1566_v63 = vld [vmem:[%s2190_s1 + $0x84] ss:$8 sps:$4 sm:$0xff]  }
  0x16   :  { %731 = vmatprep.mubr.bf16.mxu1 %v50_v52  ;;  %v1565_v0 = vld [vmem:[%s2190_s1 + $0x190] ss:$8 sps:$4 sm:$0xff]   ;;  %v1568_v1 = vld [vmem:[%s2190_s1 + $0x80] ss:$8 sps:$4 sm:$0xff]   ;;  %v1569_v2 = vld [vmem:[%s2190_s1 + $0x184] ss:$8 sps:$4 sm:$0xff]  }
  0x17   :  { %669 = vmatpush1.bf16.msra.mxu0 %v1508_v22  ;;  %v1571_v3 = vld [vmem:[%s2190_s1 + $0x180] ss:$8 sps:$4 sm:$0xff]   ;;  %v1574_v5 = vld [vmem:[%s2190_s1 + $0x274] ss:$8 sps:$4 sm:$0xff]   ;;  %v1572_v8 = vld [vmem:[%s2190_s1 + $0x270] ss:$8 sps:$4 sm:$0xff]  }
  0x18   :  { %670 = vmatprep.subr.bf16.mxu0 %v1512_v23  ;;  %710 = vmatpush1.bf16.msra.mxu1 %v1511_v24  ;;  %v42_v6 = vld [vmem:[%s2189_s0 + $0x10] sm:$0xff]  ;;  %v1577_v9 = vld [vmem:[%s2190_s1 + $0x264] ss:$8 sps:$4 sm:$0xff]   ;;  %v1617_v11 = vld [vmem:[%s2190_s1 + $0x300] ss:$8 sps:$4 sm:$0xff]   ;;  %v1676_v19 = vmov 0  }
  0x19   :  { %711 = vmatprep.subr.bf16.mxu1 %v1515_v25  ;;  %v49_v10 = vpack.c.bf16 %v42_v6, %v42_v6  ;;  %v1619_v12 = vld [vmem:[%s2190_s1 + $0x304] ss:$8 sps:$4 sm:$0xff]   ;;  %v1575_v13 = vld [vmem:[%s2190_s1 + $0x260] ss:$8 sps:$4 sm:$0xff]   ;;  %v1580_v14 = vld [vmem:[%s2190_s1 + $0x254] ss:$8 sps:$4 sm:$0xff]  }
  0x1a   :  { %v46_v15 = vld [vmem:[%s2189_s0 + $0x30] sm:$0xff]  ;;  %v45_v16 = vld [vmem:[%s2189_s0 + $0x28] sm:$0xff] }
  0x1b   :  { %671 = vmatpush1.bf16.msra.mxu0 %v1514_v26  ;;  %v52_v17 = vpack.c.bf16 %v45_v16, %v45_v16  ;;  %v1578_v18 = vld [vmem:[%s2190_s1 + $0x250] ss:$8 sps:$4 sm:$0xff]   ;;  %v1583_v20 = vld [vmem:[%s2190_s1 + $0x244] ss:$8 sps:$4 sm:$0xff]   ;;  %v53_v21 = vpack.c.bf16 %v46_v15, %v46_v15  ;;  %v1581_v22 = vld [vmem:[%s2190_s1 + $0x240] ss:$8 sps:$4 sm:$0xff]  }
  0x1c   :  { %672 = vmatprep.subr.bf16.mxu0 %v1518_v27  ;;  %712 = vmatpush1.bf16.msra.mxu1 %v1517_v28  ;;  %v1586_v23 = vld [vmem:[%s2190_s1 + $0x234] ss:$8 sps:$4 sm:$0xff]   ;;  %v1584_v24 = vld [vmem:[%s2190_s1 + $0x230] ss:$8 sps:$4 sm:$0xff]   ;;  %v1589_v25 = vld [vmem:[%s2190_s1 + $0x224] ss:$8 sps:$4 sm:$0xff]  }
  0x1d   :  { %713 = vmatprep.subr.bf16.mxu1 %v1521_v29  ;;  %v1587_v26 = vld [vmem:[%s2190_s1 + $0x220] ss:$8 sps:$4 sm:$0xff]   ;;  %v1592_v27 = vld [vmem:[%s2190_s1 + $0x214] ss:$8 sps:$4 sm:$0xff]  }
  0x1f   :  { %673 = vmatpush1.bf16.msra.mxu0 %v1520_v30 }
  0x20   :  { %674 = vmatprep.subr.bf16.mxu0 %v1524_v31  ;;  %714 = vmatpush1.bf16.msra.mxu1 %v1523_v32 }
  0x21   :  { %715 = vmatprep.subr.bf16.mxu1 %v1527_v33 }
  0x23   :  { %675 = vmatpush2.bf16.msra.mxu0 %v1526_v34 }
  0x24   :  { %676 = vmatprep.subr.bf16.mxu0 %v1530_v35  ;;  %716 = vmatpush2.bf16.msra.mxu1 %v1529_v36 }
  0x25   :  { %717 = vmatprep.subr.bf16.mxu1 %v1533_v37 }
  0x27   :  { %677 = vmatpush2.bf16.msra.mxu0 %v1532_v38 }
  0x28   :  { %678 = vmatprep.subr.bf16.mxu0 %v1536_v39  ;;  %718 = vmatpush2.bf16.msra.mxu1 %v1535_v40 }
  0x29   :  { %719 = vmatprep.subr.bf16.mxu1 %v1539_v41 }
  0x2b   :  { %679 = vmatpush2.bf16.msra.mxu0 %v1538_v42 }
  0x2c   :  { %680 = vmatprep.subr.bf16.mxu0 %v1542_v43  ;;  %720 = vmatpush2.bf16.msra.mxu1 %v1541_v44 }
  0x2d   :  { %721 = vmatprep.subr.bf16.mxu1 %v1545_v45 }
  0x2f   :  { %681 = vmatpush2.bf16.msra.mxu0 %v1544_v47 }
  0x30   :  { %682 = vmatprep.subr.bf16.mxu0 %v1548_v49  ;;  %722 = vmatpush2.bf16.msra.mxu1 %v1547_v51 }
  0x31   :  { %723 = vmatprep.subr.bf16.mxu1 %v1551_v53 }
  0x33   :  { %683 = vmatpush2.bf16.msra.mxu0 %v1550_v54 }
  0x34   :  { %684 = vmatprep.subr.bf16.mxu0 %v1554_v55  ;;  %724 = vmatpush2.bf16.msra.mxu1 %v1553_v56 }
  0x35   :  { %725 = vmatprep.subr.bf16.mxu1 %v1557_v57 }
  0x37   :  { %685 = vmatpush2.bf16.msra.mxu0 %v1556_v58 }
  0x38   :  { %686 = vmatprep.subr.bf16.mxu0 %v1560_v59  ;;  %726 = vmatpush2.bf16.msra.mxu1 %v1559_v60 }
  0x39   :  { %727 = vmatprep.subr.bf16.mxu1 %v1563_v61 }
  0x3b   :  { %687 = vmatpush2.bf16.msra.mxu0 %v1562_v62 }
  0x3c   :  { %688 = vmatprep.subr.bf16.mxu0 %v1566_v63  ;;  %728 = vmatpush2.bf16.msra.mxu1 %v1565_v0 }
  0x3d   :  { %729 = vmatprep.subr.bf16.mxu1 %v1569_v2 }
  0x3f   :  { %689 = vmatpush2.bf16.msra.mxu0 %v1568_v1 }
  0x40   :  { %740 = vmatprep.subr.bf16.mxu0 %v1574_v5  ;;  %730 = vmatpush2.bf16.msra.mxu1 %v1571_v3 }
  0x41   :  { %795 = vmatprep.subr.bf16.mxu1 %v1619_v12 }
  0x42   :  { %691 = vmatmul.mubr.bf16.vlgmr.msra.gmra.mxu0 %v47_v7 }
  0x43   :  { %741 = vmatpush1.bf16.msra.mxu0 %v1572_v8  ;;  %732 = vmatmul.mubr.bf16.vlgmr.msra.gmra.mxu1 %v49_v10 }
  0x44   :  { %742 = vmatprep.subr.bf16.mxu0 %v1577_v9  ;;  %796 = vmatpush1.bf16.msra.mxu1 %v1617_v11 }
  0x45   :  { %813 = vmatprep.mubr.bf16.mxu1 %v1676_v19  ;;  %772 = vmatprep.mubr.bf16.mxu0 %v52_v17 }
  0x46   :  { %941 = vmatprep.subr.bf16.mxu1 %v1676_v19 }
  0x47   :  { %743 = vmatpush1.bf16.msra.mxu0 %v1575_v13 }
  0x48   :  { %744 = vmatprep.subr.bf16.mxu0 %v1580_v14 }
  0x4b   :  { %745 = vmatpush1.bf16.msra.mxu0 %v1578_v18  ;;  %1379 = vmatmul.mubr.msk.bf16.vlgmr.msra.gmra.mxu1 %vm654_vm0, %v53_v21 }
  0x4c   :  { %746 = vmatprep.subr.bf16.mxu0 %v1583_v20 }
  0x4f   :  { %747 = vmatpush1.bf16.msra.mxu0 %v1581_v22 }
  0x50   :  { %748 = vmatprep.subr.bf16.mxu0 %v1586_v23 }
  0x53   :  { %749 = vmatpush1.bf16.msra.mxu0 %v1584_v24 }
  0x54   :  { %750 = vmatprep.subr.bf16.mxu0 %v1589_v25 }
  0x55   :  { %16 = vsyncpa [#allocation3], 0  ;;  %v1590_v28 = vld [vmem:[%s2190_s1 + $0x210] ss:$8 sps:$4 sm:$0xff]   ;;  %v1595_v29 = vld [vmem:[%s2190_s1 + $0x204] ss:$8 sps:$4 sm:$0xff]   ;;  %v154_v12 = vlaneseq }
  0x56   :  { %v1593_v30 = vld [vmem:[%s2190_s1 + $0x200] ss:$8 sps:$4 sm:$0xff]   ;;  %v1598_v31 = vld [vmem:[%s2190_s1 + $0x2f4] ss:$8 sps:$4 sm:$0xff]   ;;  %v1596_v32 = vld [vmem:[%s2190_s1 + $0x2f0] ss:$8 sps:$4 sm:$0xff]  }
  0x57   :  { %751 = vmatpush1.bf16.msra.mxu0 %v1587_v26  ;;  %v1601_v33 = vld [vmem:[%s2190_s1 + $0x2e4] ss:$8 sps:$4 sm:$0xff]   ;;  %v1599_v34 = vld [vmem:[%s2190_s1 + $0x2e0] ss:$8 sps:$4 sm:$0xff]   ;;  %v1604_v35 = vld [vmem:[%s2190_s1 + $0x2d4] ss:$8 sps:$4 sm:$0xff]  }
  0x58   :  { %752 = vmatprep.subr.bf16.mxu0 %v1592_v27  ;;  %v1602_v36 = vld [vmem:[%s2190_s1 + $0x2d0] ss:$8 sps:$4 sm:$0xff]   ;;  %v1607_v37 = vld [vmem:[%s2190_s1 + $0x2c4] ss:$8 sps:$4 sm:$0xff]   ;;  %v1605_v38 = vld [vmem:[%s2190_s1 + $0x2c0] ss:$8 sps:$4 sm:$0xff]  }
  0x59   :  { %v1610_v39 = vld [vmem:[%s2190_s1 + $0x2b4] ss:$8 sps:$4 sm:$0xff]   ;;  %v1608_v40 = vld [vmem:[%s2190_s1 + $0x2b0] ss:$8 sps:$4 sm:$0xff]   ;;  %v1613_v41 = vld [vmem:[%s2190_s1 + $0x2a4] ss:$8 sps:$4 sm:$0xff]  }
  0x5a   :  { %v1611_v42 = vld [vmem:[%s2190_s1 + $0x2a0] ss:$8 sps:$4 sm:$0xff]   ;;  %v1616_v43 = vld [vmem:[%s2190_s1 + $0x294] ss:$8 sps:$4 sm:$0xff]   ;;  %v1614_v44 = vld [vmem:[%s2190_s1 + $0x290] ss:$8 sps:$4 sm:$0xff]  }
  0x5b   :  { %753 = vmatpush1.bf16.msra.mxu0 %v1590_v28  ;;  %v1622_v45 = vld [vmem:[%s2190_s1 + $0x284] ss:$8 sps:$4 sm:$0xff]   ;;  %v1620_v46 = vld [vmem:[%s2190_s1 + $0x280] ss:$8 sps:$4 sm:$0xff]   ;;  %v1623_v49 = vld [vmem:[%s2192_s3 + $0x38] sm:$0xff]   ;;  %vm937_vm1 = vcmask 1043456  }
  0x5c   :  { %754 = vmatprep.subr.bf16.mxu0 %v1595_v29  ;;  %v44_v47 = vld [vmem:[%s2189_s0 + $0x20] sm:$0xff]  ;;  %942 = vmatpush1.bf16.msra.mxu1 %v1623_v49  ;;  %v1624_v50 = vld [vmem:[%s2192_s3 + $0x30] sm:$0xff]   ;;  %v1625_v51 = vld [vmem:[%s2192_s3 + $0x28] sm:$0xff]   ;;  %v1677_v63 = vmov 0.0   ;;  %v155_v13 = vshrl.u32 %v154_v12, 7  ;;  %vm1046_vm2 = vcmask 1041408  }
  0x5d   :  { %v51_v48 = vpack.c.bf16 %v44_v47, %v44_v47  ;;  %943 = vmatprep.subr.bf16.mxu1 %v1676_v19  ;;  %v1626_v52 = vld [vmem:[%s2192_s3 + $0x20] sm:$0xff]   ;;  %v1627_v53 = vld [vmem:[%s2192_s3 + $0x18] sm:$0xff]   ;;  %v1628_v54 = vld [vmem:[%s2192_s3 + $0x10] sm:$0xff]   ;;  %vm933_vm3 = vcmask 588800   ;;  %vm1678_vm4 = vmmov 0   ;;  %vm1139_vm5 = vcmask 1042432  }
  0x5e   :  { %v1629_v55 = vld [vmem:[%s2192_s3 + $0x8] sm:$0xff]   ;;  %v1630_v56 = vld [vmem:[%s2192_s3] sm:$0xff]   ;;  %v1632_v59 = vld [vmem:[%s2192_s3 + $0x58] sm:$0xff]   ;;  %v156_v14 = vsub.s32 0, %v155_v13  ;;  %v160_v16 = vsub.s32 1, %v155_v13  ;;  %vm1042_vm6 = vcmask 818176  }
  0x5f   :  { %755 = vmatpush1.bf16.msra.mxu0 %v1593_v30  ;;  %v1631_v57 = vld [vmem:[%s2192_s3 + $0x60] ss:$0 sps:$4 sm:$0xff]   ;;  %v1633_v60 = vld [vmem:[%s2192_s3 + $0x50] sm:$0xff]   ;;  %v1634_v61 = vld [vmem:[%s2192_s3 + $0x48] sm:$0xff]   ;;  %vm1211_vm7 = vcmask 1046528   ;;  %vm1135_vm8 = vcmask 572416  }
  0x60   :  { %756 = vmatprep.subr.bf16.mxu0 %v1598_v31  ;;  %944 = vmatpush1.bf16.msra.mxu1 %v1624_v50  ;;  %v939_v58 = vsel %vm937_vm1, %v1631_v57, 0  ;;  %v1635_v62 = vld [vmem:[%s2192_s3 + $0x40] sm:$0xff]   ;;  %vm1207_vm9 = vcmask 244736  }
  0x61   :  { %945 = vmatprep.subr.bf16.mxu1 %v1676_v19  ;;  %v152_v15 = vld [vmem:[%s2191_s2] sm:$0x3] }
  0x62   :  { %v157_v17 = vrot.slane %v152_v15, %v156_v14  ;;  %v161_v18 = vrot.slane %v152_v15, %v160_v16  ;;  %v1380_v47 = vld [vmem:[%s2193_s4] ss:$0 sm:$0xff] }
  0x63   :  { %757 = vmatpush2.bf16.msra.mxu0 %v1596_v32  ;;  %v1636_v32 = vld [vmem:[%s2194_s5 + $0x30] ss:$0 sps:$4 sm:$0x33]   ;;  %v1395_v57 = vld [vmem:[%s2195_s6] ss:$0 sm:$0xff] }
  0x64   :  { %758 = vmatprep.subr.bf16.mxu0 %v1601_v33  ;;  %946 = vmatpush1.bf16.msra.mxu1 %v1625_v51 }
  0x65   :  { %947 = vmatprep.subr.bf16.mxu1 %v1676_v19 }
  0x67   :  { %759 = vmatpush2.bf16.msra.mxu0 %v1599_v34 }
  0x68   :  { %760 = vmatprep.subr.bf16.mxu0 %v1604_v35  ;;  %948 = vmatpush1.bf16.msra.mxu1 %v1626_v52 }
  0x69   :  { %949 = vmatprep.subr.bf16.mxu1 %v1676_v19 }
  0x6b   :  { %761 = vmatpush2.bf16.msra.mxu0 %v1602_v36  ;;  %v1048_v36 = vsel %vm1046_vm2, %v1636_v32, 0 }
  0x6c   :  { %762 = vmatprep.subr.bf16.mxu0 %v1607_v37  ;;  %950 = vmatpush1.bf16.msra.mxu1 %v1627_v53  ;;  %v1637_v37 = vld [vmem:[%s2194_s5 + $0x28] sm:$0xff]  }
  0x6d   :  { %951 = vmatprep.subr.bf16.mxu1 %v1676_v19 }
  0x6f   :  { %763 = vmatpush2.bf16.msra.mxu0 %v1605_v38  ;;  %v1638_v38 = vld [vmem:[%s2194_s5 + $0x20] sm:$0xff]  }
  0x70   :  { %764 = vmatprep.subr.bf16.mxu0 %v1610_v39  ;;  %952 = vmatpush1.bf16.msra.mxu1 %v1628_v54  ;;  %v1639_v39 = vld [vmem:[%s2194_s5 + $0x18] sm:$0xff]  }
  0x71   :  { %953 = vmatprep.subr.bf16.mxu1 %v1676_v19 }
  0x73   :  { %765 = vmatpush2.bf16.msra.mxu0 %v1608_v40  ;;  %v1640_v40 = vld [vmem:[%s2194_s5 + $0x10] sm:$0xff]  }
  0x74   :  { %766 = vmatprep.subr.bf16.mxu0 %v1613_v41  ;;  %954 = vmatpush1.bf16.msra.mxu1 %v1629_v55  ;;  %v1641_v41 = vld [vmem:[%s2194_s5 + $0x8] sm:$0xff]  }
  0x75   :  { %955 = vmatprep.subr.bf16.mxu1 %v1676_v19  ;;  %v1646_v55 = vld [vmem:[%s2196_s7 + $0x8] sm:$0xff]  }
  0x77   :  { %767 = vmatpush2.bf16.msra.mxu0 %v1611_v42  ;;  %v1642_v42 = vld [vmem:[%s2194_s5] sm:$0xff]  }
  0x78   :  { %768 = vmatprep.subr.bf16.mxu0 %v1616_v43  ;;  %956 = vmatpush1.bf16.msra.mxu1 %v1630_v56  ;;  %v1643_v43 = vld [vmem:[%s2196_s7 + $0x20] ss:$0 sps:$4 sm:$0x77]  }
  0x79   :  { %963 = vmatprep.subr.bf16.mxu1 %v1676_v19  ;;  %v1647_v56 = vld [vmem:[%s2196_s7] sm:$0xff]  }
  0x7b   :  { %769 = vmatpush2.bf16.msra.mxu0 %v1614_v44  ;;  %v1141_v44 = vsel %vm1139_vm5, %v1643_v43, 0 }
  0x7c   :  { %770 = vmatprep.subr.bf16.mxu0 %v1622_v45  ;;  %964 = vmatpush2.bf16.msra.mxu1 %v939_v58  ;;  %v1644_v45 = vld [vmem:[%s2196_s7 + $0x18] sm:$0xff]  }
  0x7d   :  { %965 = vmatprep.subr.bf16.mxu1 %v1676_v19 }
  0x7f   :  { %771 = vmatpush2.bf16.msra.mxu0 %v1620_v46  ;;  %v1645_v46 = vld [vmem:[%s2196_s7 + $0x10] sm:$0xff]  }
  0x80   :  { %966 = vmatpush2.bf16.msra.mxu1 %v1632_v59  ;;  %1450 = vmatprep.subr.bf16.mxu0 %v1677_v63 }
  0x81   :  { %967 = vmatprep.subr.bf16.mxu1 %v1676_v19 }
  0x82   :  { %773 = vmatmul.mubr.bf16.vlgmr.msra.gmra.mxu0 %v51_v48 }
  0x83   :  { %1460 = vmatprep.mubr.msk.bf16.mxu0 %vm1678_vm4, %v1677_v63  ;;  %1451 = vmatpush3.bf16.msra.mxu0 %v1141_v44 }
  0x84   :  { %968 = vmatpush2.bf16.msra.mxu1 %v1633_v60  ;;  %1452 = vmatprep.subr.bf16.mxu0 %v1677_v63  ;;  %v1648_v60 = vld [vmem:[%s2198_s9 + $0x8] sm:$0x7f]  }
  0x85   :  { %969 = vmatprep.subr.bf16.mxu1 %v1676_v19 }
  0x87   :  { %1453 = vmatpush3.bf16.msra.mxu0 %v1644_v45 }
  0x88   :  { %970 = vmatpush2.bf16.msra.mxu1 %v1634_v61  ;;  %1454 = vmatprep.subr.bf16.mxu0 %v1677_v63 }
  0x89   :  { %971 = vmatprep.subr.bf16.mxu1 %v1676_v19 }
  0x8b   :  { %1455 = vmatpush3.bf16.msra.mxu0 %v1645_v46 }
  0x8c   :  { %972 = vmatpush2.bf16.msra.mxu1 %v1635_v62  ;;  %1456 = vmatprep.subr.bf16.mxu0 %v1677_v63 }
  0x8d   :  { %1432 = vmatprep.subr.bf16.mxu1 %v1677_v63 }
  0x8f   :  { %1457 = vmatpush3.bf16.msra.mxu0 %v1646_v55 }
  0x90   :  { %1458 = vmatprep.subr.bf16.mxu0 %v1677_v63 }
  0x93   :  { %1459 = vmatpush3.bf16.msra.mxu0 %v1647_v56 }
  0x94   :  { %1464 = vmatprep.subr.bf16.mxu0 %v1677_v63 }
 0x102   :  { %v692_v0 = vpop.f32.mrf.mxu0 }
 0x103   :  { %v733_v2 = vpop.f32.mrf.mxu1  ;;  %v693_v19 = vadd.f32 %v692_v0, %v157_v17 }
 0x104   :  { %v694_v1 = vpop.f32.mrf.mxu0 }
 0x105   :  { %v735_v4 = vpop.f32.mrf.mxu1  ;;  %v695_v20 = vadd.f32 %v694_v1, %v161_v18  ;;  %v734_v21 = vadd.f32 %v733_v2, %v693_v19  ;;  %v1213_v2 = vsel %vm1211_vm7, %v1648_v60, 0 }
 0x106   :  { %v696_v3 = vpop.f32.mrf.mxu0 }
 0x107   :  { %v737_v6 = vpop.f32.mrf.mxu1  ;;  %v736_v23 = vadd.f32 %v735_v4, %v695_v20  ;;  %v1649_v4 = vld [vmem:[%s2198_s9] sm:$0xff]  }
 0x108   :  { %v697_v5 = vpop.f32.mrf.mxu0 }
 0x109   :  { %v738_v7 = vpop.f32.mrf.mxu1  ;;  %v1404_v5 = vld [vmem:[%s2197_s8] ss:$0 sm:$0xff]  ;;  %s1679_s8 = smov [#allocation2]  }
 0x10a   :  { %s1273_s9 = sshll.u32 %s1679_s8, 4  ;;  %s1274_s9 = int_to_ptr.vmem [resolvable:$true] %s1273_s9 }
 0x10b   :  { %v815_v8 = vpop.f32.mrf.mxu1  ;;  %p1659_p1 = scmp.lt.s32.totalorder %s1274_s9, %s1274_s9 }
 0x10d   :  { %v817_v9 = vpop.f32.mrf.mxu1 }
 0x10f   :  { %v819_v10 = vpop.f32.mrf.mxu1 }
 0x111   :  { %v820_v11 = vpop.f32.mrf.mxu1 }
 0x142   :  { %v774_v22 = vpop.f32.mrf.mxu0 }
 0x143   :  { %v775_v24 = vadd.f32 %v774_v22, %v734_v21 }
 0x144   :  { %v776_v25 = vpop.f32.mrf.mxu0 }
 0x145   :  { %v816_v26 = vadd.f32 %v815_v8, %v775_v24  ;;  %v777_v27 = vadd.f32 %v776_v25, %v736_v23 }
 0x146   :  { %v778_v28 = vpop.f32.mrf.mxu0 }
 0x147   :  { %v818_v29 = vadd.f32 %v817_v9, %v777_v27  ;;  %v822_v30 = vmax.f32 %v816_v26, 0.0 }
 0x148   :  { %v779_v31 = vpop.f32.mrf.mxu0 }
 0x149   :  { %v823_v33 = vmax.f32 %v818_v29, 0.0  ;;  %v824_v35 = vpack.c.bf16 %v822_v30, %v822_v30 }
 0x14b   :  { %v825_v34 = vpack.c.bf16 %v823_v33, %v823_v33 }
 0x14d   :  { %1394 = vmatprep.mubr.msk.bf16.mxu1 %vm933_vm3, %v825_v34 }
 0x14e   :  { %974 = vmatmul.mubr.bf16.vlgmr.msra.gmra.mxu1 %v824_v35 }
 0x14f   :  { %1433 = vmatpush3.bf16.msra.mxu1 %v1048_v36  ;;  %1446 = vmatprep.mubr.msk.bf16.mxu1 %vm1678_vm4, %v1677_v63 }
 0x150   :  { %1434 = vmatprep.subr.bf16.mxu1 %v1677_v63 }
 0x153   :  { %1435 = vmatpush3.bf16.msra.mxu1 %v1637_v37 }
 0x154   :  { %1436 = vmatprep.subr.bf16.mxu1 %v1677_v63 }
 0x157   :  { %1437 = vmatpush3.bf16.msra.mxu1 %v1638_v38 }
 0x158   :  { %1438 = vmatprep.subr.bf16.mxu1 %v1677_v63 }
 0x15b   :  { %1439 = vmatpush3.bf16.msra.mxu1 %v1639_v39 }
 0x15c   :  { %1440 = vmatprep.subr.bf16.mxu1 %v1677_v63 }
 0x15f   :  { %1441 = vmatpush3.bf16.msra.mxu1 %v1640_v40 }
 0x160   :  { %1442 = vmatprep.subr.bf16.mxu1 %v1677_v63 }
 0x163   :  { %1443 = vmatpush3.bf16.msra.mxu1 %v1641_v41 }
 0x164   :  { %1444 = vmatprep.subr.bf16.mxu1 %v1677_v63 }
 0x167   :  { %1445 = vmatpush3.bf16.msra.mxu1 %v1642_v42 }
 0x20e   :  { %v975_v48 = vpop.f32.mrf.mxu1 }
 0x20f   :  { %v976_v49 = vadd.f32 %v1380_v47, %v975_v48 }
 0x210   :  { %v977_v50 = vpop.f32.mrf.mxu1 }
 0x211   :  { %v981_v51 = vmax.f32 %v976_v49, 0.0 }
 0x212   :  { %v978_v52 = vpop.f32.mrf.mxu1 }
 0x213   :  { %v982_v53 = vpack.c.bf16 %v981_v51, %v981_v51 }
 0x214   :  { %v979_v54 = vpop.f32.mrf.mxu1 }
 0x215   :  { %1447 = vmatmul.mubr.msk.bf16.vlgmr.msra.gmra.mxu1 %vm1042_vm6, %v982_v53 }
 0x2d5   :  { %v1084_v58 = vpop.f32.mrf.mxu1 }
 0x2d6   :  { %v1085_v59 = vadd.f32 %v1395_v57, %v1084_v58 }
 0x2d7   :  { %v1448_v61 = vpop.f32.mrf.mxu1 }
 0x2d8   :  { %v1090_v62 = vmax.f32 %v1085_v59, 0.0 }
 0x2d9   :  { %v1087_v0 = vpop.f32.mrf.mxu1 }
 0x2da   :  { %v1091_v1 = vpack.c.bf16 %v1090_v62, %v1090_v62 }
 0x2db   :  { %v1449_v3 = vpop.f32.mrf.mxu1 }
 0x2dc   :  { %1461 = vmatmul.mubr.msk.bf16.vlgmr.msra.gmra.mxu0 %vm1135_vm8, %v1091_v1 }
 0x2dd   :  { %1465 = vmatpush3.bf16.msra.mxu0 %v1213_v2  ;;  %1468 = vmatprep.mubr.msk.bf16.mxu0 %vm1678_vm4, %v1677_v63 }
 0x2de   :  { %1466 = vmatprep.subr.bf16.mxu0 %v1677_v63  ;;  %v1411_v63 = vld [vmem:[%s2199_s10] ss:$0 sm:$0xff]  ;;  %s1654_s10 = scalar_lea.vmem %s1274_s9, 64 }
 0x2df   :  { %p1655_p0 = scmp.ne.s32.totalorder %s1274_s9, %s1654_s10  ;;  %p1660_p2 = scmp.lt.s32.totalorder %s1654_s10, %s1654_s10 }
 0x2e1   :  { %1467 = vmatpush3.bf16.msra.mxu0 %v1649_v4  ;;  %p1661_p3 = por %p1660_p2, %p1659_p1 }
 0x2e3   :  { %p1662_p4 = pnand %p1661_p3, %p1655_p0 }
 0x39c   :  { %v1177_v6 = vpop.f32.mrf.mxu0 }
 0x39d   :  { %v1178_v7 = vadd.f32 %v1404_v5, %v1177_v6 }
 0x39e   :  { %v1462_v8 = vpop.f32.mrf.mxu0 }
 0x39f   :  { %v1183_v9 = vmax.f32 %v1178_v7, 0.0 }
 0x3a0   :  { %v1180_v10 = vpop.f32.mrf.mxu0 }
 0x3a1   :  { %v1184_v11 = vpack.c.bf16 %v1183_v9, %v1183_v9 }
 0x3a2   :  { %v1463_v12 = vpop.f32.mrf.mxu0 }
 0x3a3   :  { %1469 = vmatmul.mubr.msk.bf16.vlgmr.msra.gmra.mxu0 %vm1207_vm9, %v1184_v11 }
 0x463   :  { %v1249_v13 = vpop.f32.mrf.mxu0 }
 0x464   :  { %v1250_v14 = vadd.f32 %v1411_v63, %v1249_v13 }
 0x465   :  { %v1470_v15 = vpop.f32.mrf.mxu0 }
 0x466   :  { %1255 = vmax.xlane.f32.xlu0 %v1250_v14 }
 0x467   :  { %v1252_v16 = vpop.f32.mrf.mxu0 }
 0x469   :  { %v1471_v17 = vpop.f32.mrf.mxu0 }
 0x4ef   :  { %v1256_v18 = vpop.xlane.xlu0 %1255 }
 0x4f0   :  { %v1257_v19 = vsub.f32 %v1250_v14, %v1256_v18 }
 0x4f2   :  { %v1258_v20 = vmul.f32 1.442695, %v1257_v19 }
 0x4f4   :  { %1650 = vpow2.f32 %v1258_v20 }
 0x501   :  { %v1651_v21 = vpop.eup %1650 }
 0x502   :  { %1260 = vadd.xlane.f32.xlu0 %v1651_v21 }
 0x58b   :  { %v1261_v22 = vpop.xlane.xlu0 %1260 }
 0x58c   :  { %1652 = vlog2.f32 %v1261_v22 }
 0x599   :  { %v1653_v23 = vpop.eup %1652 }
 0x59a   :  { %v1263_v24 = vmul.f32 0.6931472, %v1653_v23 }
 0x59c   :  { %v1264_v25 = vsub.f32 %v1257_v19, %v1263_v24 }
 0x59e   :  { %v1265_v26 = vpack.c.bf16 %v1264_v25, %v1264_v25 }
 0x5a0   :  { %1266 = vst [vmem:[#allocation2] sm:$0xf] %v1265_v26 }
 0x5a1   :  { %1665 = shalt.err (!%p1662_p4)
}
 0x5a2   :  { %1276 = dma.vmem_to_hbm [thread:$0]  %s1274_s9, 64, %s2200_s11, [#allocation3]  }
 0x5a3   :  { %1674 = dma.done.wait [#allocation3], 64  }
 0x5a4   :  { %1675 = vsyncadd [#allocation3], 4294967232 }
 0x5a5   :  { %1280 = vsyncpa [#allocation3], 1 }

</bundles_post_ra>
